<compile_context>
chip_gen: v7x
topology: tpu7x:2x2x1
jax: 0.10.0
libtpu: 0.0.40
codegen_flags: <defaults>
</compile_context>

<pallas_src>
import functools

import jax
import jax.numpy as jnp
from jax import lax
from jax.experimental import pallas as pl
from jax.experimental.pallas import tpu as pltpu

EPS = 1e-5
NEG_SLOPE = 0.01
LANE = 128


# ---------------------------------------------------------------------------
# Small helpers
# ---------------------------------------------------------------------------
def _round_up(x, m):
    return ((x + m - 1) // m) * m


def _cdiv(a, b):
    return -(-a // b)


def _min_sublane(dtype):
    # Minimum second-to-last tile multiple: f32 -> 8, bf16 -> 16, int8/fp8 -> 32.
    return max(8, 32 // jnp.dtype(dtype).itemsize)


def _vmem_capacity_bytes():
    try:
        info = pltpu.get_tpu_info()
        cap = int(getattr(info, "vmem_capacity_bytes", 0))
        if cap > 0:
            return cap
    except Exception:
        pass
    return 64 * 1024 * 1024  # conservative fallback (v7x per-core VMEM)


def _vmem_limit_bytes(need_bytes, vmem_cap):
    hi = int(0.9 * vmem_cap)            # generation-aware ceiling
    lo = min(32 * 1024 * 1024, hi)      # comfortable floor
    return int(min(hi, max(lo, 2 * need_bytes)))


# ---------------------------------------------------------------------------
# Fused resident-x kernel: BN stats + affine BN + LeakyReLU + matmul + residual
# ---------------------------------------------------------------------------
def _fused_kernel(*refs, identity_res):
    if identity_res:
        x_ref, gamma_ref, beta_ref, wm_ref, b_ref, o_ref = refs
        wr_ref = None
    else:
        x_ref, gamma_ref, beta_ref, wm_ref, wr_ref, b_ref, o_ref = refs

    x = x_ref[...].astype(jnp.float32)                       # (N, Din)
    inv_n = 1.0 / x.shape[0]
    mean = jnp.sum(x, axis=0, keepdims=True) * inv_n
    xc = x - mean
    var = jnp.sum(xc * xc, axis=0, keepdims=True) * inv_n    # biased variance
    scale = gamma_ref[...].astype(jnp.float32) * lax.rsqrt(var + EPS)
    shift = beta_ref[...].astype(jnp.float32) - mean * scale

    x_bn = x * scale + shift
    h = jnp.where(x_bn >= 0, x_bn, NEG_SLOPE * x_bn)          # LeakyReLU(0.01)

    out = jnp.dot(h.astype(wm_ref.dtype), wm_ref[...],
                  preferred_element_type=jnp.float32)
    if identity_res:
        out = out + x                                         # cheap VPU add
    else:
        out = out + jnp.dot(x.astype(wr_ref.dtype), wr_ref[...],
                            preferred_element_type=jnp.float32)
    out = out + b_ref[...]
    o_ref[...] = out.astype(o_ref.dtype)


# ---------------------------------------------------------------------------
# Streaming pass 1: full-batch BN statistics -> per-feature affine (scale, shift)
# ---------------------------------------------------------------------------
def _bn_stats_kernel(x_ref, gamma_ref, beta_ref, scale_ref, shift_ref,
                     sum_ref, sumsq_ref, *, n_rows, tile_n, mask_tail):
    i = pl.program_id(0)

    @pl.when(i == 0)
    def _():
        sum_ref[...] = jnp.zeros_like(sum_ref)
        sumsq_ref[...] = jnp.zeros_like(sumsq_ref)

    x = x_ref[...].astype(jnp.float32)
    if mask_tail:
        # Grid may overshoot n_rows; out-of-bounds rows hold unspecified data.
        rows = lax.broadcasted_iota(jnp.int32, x.shape, 0) + i * tile_n
        x = jnp.where(rows < n_rows, x, 0.0)

    sum_ref[...] += jnp.sum(x, axis=0, keepdims=True)
    sumsq_ref[...] += jnp.sum(x * x, axis=0, keepdims=True)

    @pl.when(i == pl.num_programs(0) - 1)
    def _():
        inv_n = 1.0 / n_rows
        mean = sum_ref[...] * inv_n
        # NOTE: E[x^2]-mean^2 can lose precision if |mean| >> std; clamp >= 0.
        var = jnp.maximum(sumsq_ref[...] * inv_n - mean * mean, 0.0)
        scale = gamma_ref[...].astype(jnp.float32) * lax.rsqrt(var + EPS)
        scale_ref[...] = scale
        shift_ref[...] = beta_ref[...].astype(jnp.float32) - mean * scale


# ---------------------------------------------------------------------------
# Streaming pass 2: per-batch-tile affine BN -> LeakyReLU -> matmul(s) + residual
# ---------------------------------------------------------------------------
def _main_kernel(*refs, identity_res):
    if identity_res:
        scale_ref, shift_ref, x_ref, wm_ref, b_ref, o_ref = refs
        wr_ref = None
    else:
        scale_ref, shift_ref, x_ref, wm_ref, wr_ref, b_ref, o_ref = refs

    x = x_ref[...].astype(jnp.float32)                        # (TILE_N, Din)
    x_bn = x * scale_ref[...] + shift_ref[...]                # folded-affine BN
    h = jnp.where(x_bn >= 0, x_bn, NEG_SLOPE * x_bn)          # LeakyReLU(0.01)

    out = jnp.dot(h.astype(wm_ref.dtype), wm_ref[...],
                  preferred_element_type=jnp.float32)
    if identity_res:
        out = out + x                                          # identity residual
    else:
        out = out + jnp.dot(x.astype(wr_ref.dtype), wr_ref[...],
                            preferred_element_type=jnp.float32)
    out = out + b_ref[...]
    o_ref[...] = out.astype(o_ref.dtype)


# ---------------------------------------------------------------------------
# Parameters
# ---------------------------------------------------------------------------
def init_dense_block_res_params(key, n_inputs, n_outputs, dtype=jnp.float32):
    """Synthetic parameters with the same shapes as the PyTorch module."""
    k1, k2, k3, k4 = jax.random.split(key, 4)
    params = {
        "gamma": jnp.ones((n_inputs,), dtype),
        "beta": jnp.zeros((n_inputs,), dtype),
        "w": jax.random.normal(k1, (n_outputs, n_inputs), dtype) * 0.05,
        "b": jax.random.normal(k2, (n_outputs,), dtype) * 0.05,
    }
    if n_inputs != n_outputs:
        params["w_down"] = jax.random.normal(k3, (n_outputs, n_inputs), dtype) * 0.05
        params["b_down"] = jax.random.normal(k4, (n_outputs,), dtype) * 0.05
    return params


def prepare_params(params, use_bf16_matmul=False):
    """One-time prep: transpose weights, pre-sum biases, pick matmul dtype.
    Identity residual is NOT materialized as a weight (handled as a VPU add)."""
    w = params["w"]                                  # (Dout, Din) torch layout
    d_out, d_in = w.shape
    mm_dtype = jnp.bfloat16 if use_bf16_matmul else jnp.float32
    prep = {
        "gamma": params["gamma"].astype(jnp.float32).reshape(1, d_in),
        "beta": params["beta"].astype(jnp.float32).reshape(1, d_in),
        "w_main": w.T.astype(mm_dtype),              # (Din, Dout)
        "d_in": int(d_in),
        "d_out": int(d_out),
    }
    if "w_down" in params:
        prep["identity_res"] = False
        prep["w_res"] = params["w_down"].T.astype(mm_dtype)
        prep["b_sum"] = (params["b"].astype(jnp.float32)
                         + params["b_down"].astype(jnp.float32)).reshape(1, d_out)
    else:
        assert d_in == d_out, "identity residual requires n_inputs == n_outputs"
        prep["identity_res"] = True
        prep["b_sum"] = params["b"].astype(jnp.float32).reshape(1, d_out)
    return prep


# ---------------------------------------------------------------------------
# Tile selection (generation-aware VMEM budgets, minimal batch padding)
# ---------------------------------------------------------------------------
def _choose_stats_tile(n, d_in, sublane, vmem_cap):
    budget = int(min(0.4 * vmem_cap, 64 * 1024 * 1024))
    per_row = 3 * 4 * d_in                  # double-buffered input + f32 temp
    cap = budget // max(per_row, 1)
    cap = int(max(sublane, min(4096, cap)))
    cap = (cap // sublane) * sublane
    num_tiles = max(1, _cdiv(n, cap))
    return max(sublane, _round_up(_cdiv(n, num_tiles), sublane))


def _choose_tile_n(n, d_in, d_out, w_resident_bytes, sublane, vmem_cap):
    budget = int(min(0.45 * vmem_cap, 96 * 1024 * 1024))
    per_row = 4 * 4 * (d_in + d_out)        # dbl-buffered in/out tiles + f32 temps
    cap = (budget - 2 * w_resident_bytes) // max(per_row, 1)   # 2x: dbl-buffered W
    cap = int(max(sublane, min(2048, cap)))
    cap = (cap // sublane) * sublane
    num_tiles = max(1, _cdiv(n, cap))
    # v7x megacore: give the "parallel" batch axis at least 2 tiles when cheap.
    if num_tiles == 1 and n >= 4 * sublane:
        num_tiles = 2
    tile_n = _round_up(_cdiv(n, num_tiles), sublane)
    return max(sublane, min(tile_n, _round_up(n, sublane)))


# ---------------------------------------------------------------------------
# Wrapper
# ---------------------------------------------------------------------------
def dense_block_res(x, prep, force_two_pass=False):
    n, d_in = x.shape
    assert d_in == prep["d_in"]
    d_out = prep["d_out"]
    identity = prep["identity_res"]

    sublane = _min_sublane(x.dtype)
    vmem_cap = _vmem_capacity_bytes()
    item = jnp.dtype(x.dtype).itemsize

    w_bytes = prep["w_main"].size * prep["w_main"].dtype.itemsize
    if not identity:
        w_bytes += prep["w_res"].size * prep["w_res"].dtype.itemsize

    const_index = lambda i: (0, 0)

    # ---------------- fused resident-x fast path ----------------
    x_bytes = n * d_in * item
    out_bytes = n * d_out * item
    work_bytes = n * (2 * d_in + d_out) * 4           # f32 temps inside kernel
    fused_need = 2 * (x_bytes + out_bytes + w_bytes) + work_bytes + (1 << 20)
    if (not force_two_pass) and fused_need <= int(0.45 * vmem_cap):
        in_specs = [pl.BlockSpec((n, d_in), const_index),        # x (resident)
                    pl.BlockSpec((1, d_in), const_index),        # gamma
                    pl.BlockSpec((1, d_in), const_index),        # beta
                    pl.BlockSpec((d_in, d_out), const_index)]    # W_main
        args = [x, prep["gamma"], prep["beta"], prep["w_main"]]
        if not identity:
            in_specs.append(pl.BlockSpec((d_in, d_out), const_index))  # W_res
            args.append(prep["w_res"])
        in_specs.append(pl.BlockSpec((1, d_out), const_index))   # bias
        args.append(prep["b_sum"])

        return pl.pallas_call(
            functools.partial(_fused_kernel, identity_res=identity),
            out_shape=jax.ShapeDtypeStruct((n, d_out), x.dtype),
            grid_spec=pltpu.PrefetchScalarGridSpec(
                num_scalar_prefetch=0,
                grid=(1,),
                in_specs=in_specs,
                out_specs=pl.BlockSpec((n, d_out), const_index)),
            compiler_params=pltpu.CompilerParams(
                dimension_semantics=("arbitrary",),
                vmem_limit_bytes=_vmem_limit_bytes(fused_need, vmem_cap)),
        )(*args)

    # ---------------- streaming two-pass path ----------------
    # Pass 1: full-batch BN stats with an independent, large batch tile.
    tile_s = _choose_stats_tile(n, d_in, sublane, vmem_cap)
    grid_s = _cdiv(n, tile_s)
    mask_tail = (n % tile_s) != 0
    need1 = 2 * tile_s * d_in * item + tile_s * d_in * 4 + 8 * d_in * 4 + (1 << 20)

    scale, shift = pl.pallas_call(
        functools.partial(_bn_stats_kernel, n_rows=n, tile_n=tile_s,
                          mask_tail=mask_tail),
        out_shape=(jax.ShapeDtypeStruct((1, d_in), jnp.float32),
                   jax.ShapeDtypeStruct((1, d_in), jnp.float32)),
        grid_spec=pltpu.PrefetchScalarGridSpec(
            num_scalar_prefetch=0,
            grid=(grid_s,),
            in_specs=[pl.BlockSpec((tile_s, d_in), lambda i: (i, 0)),
                      pl.BlockSpec((1, d_in), const_index),
                      pl.BlockSpec((1, d_in), const_index)],
            out_specs=[pl.BlockSpec((1, d_in), const_index),
                       pl.BlockSpec((1, d_in), const_index)],
            scratch_shapes=[pltpu.VMEM((1, d_in), jnp.float32),
                            pltpu.VMEM((1, d_in), jnp.float32)]),
        compiler_params=pltpu.CompilerParams(
            dimension_semantics=("arbitrary",),
            vmem_limit_bytes=_vmem_limit_bytes(need1, vmem_cap)),
    )(x, prep["gamma"], prep["beta"])

    # Pass 2: batch-tiled affine BN + LeakyReLU + matmul(s) + residual.
    # TODO(synk): if w_bytes ever exceeds a few MiB on v7x, add a d_out grid axis
    # (column-tile the weights) instead of keeping them fully VMEM-resident.
    tile_n = _choose_tile_n(n, d_in, d_out, w_bytes, sublane, vmem_cap)
    grid_n = _cdiv(n, tile_n)
    need2 = (2 * w_bytes                                   # dbl-buffered weights
             + 2 * tile_n * (d_in + d_out) * item          # dbl-buffered in/out
             + 2 * tile_n * (d_in + d_out) * 4             # f32 temps
             + 8 * (2 * d_in + d_out) * 4 + (1 << 20))

    in_specs = [pl.BlockSpec((1, d_in), const_index),          # scale
                pl.BlockSpec((1, d_in), const_index),          # shift
                pl.BlockSpec((tile_n, d_in), lambda i: (i, 0)),  # x tile
                pl.BlockSpec((d_in, d_out), const_index)]      # W_main
    args = [scale, shift, x, prep["w_main"]]
    if not identity:
        in_specs.append(pl.BlockSpec((d_in, d_out), const_index))  # W_res
        args.append(prep["w_res"])
    in_specs.append(pl.BlockSpec((1, d_out), const_index))     # bias
    args.append(prep["b_sum"])

    return pl.pallas_call(
        functools.partial(_main_kernel, identity_res=identity),
        out_shape=jax.ShapeDtypeStruct((n, d_out), x.dtype),
        grid_spec=pltpu.PrefetchScalarGridSpec(
            num_scalar_prefetch=0,
            grid=(grid_n,),
            in_specs=in_specs,
            out_specs=pl.BlockSpec((tile_n, d_out), lambda i: (i, 0))),
        compiler_params=pltpu.CompilerParams(
            dimension_semantics=("parallel",),
            vmem_limit_bytes=_vmem_limit_bytes(need2, vmem_cap)),
    )(*args)


# ---------------------------------------------------------------------------
# Pure-JAX reference of the PyTorch forward (training-mode BN)
# ---------------------------------------------------------------------------
def _reference(x, params):
    x = x.astype(jnp.float32)
    mean = jnp.mean(x, axis=0, keepdims=True)
    var = jnp.mean((x - mean) ** 2, axis=0, keepdims=True)
    x_bn = (x - mean) / jnp.sqrt(var + EPS) * params["gamma"] + params["beta"]
    h = jnp.where(x_bn >= 0, x_bn, NEG_SLOPE * x_bn)
    out = h @ params["w"].T + params["b"]
    if "w_down" in params:
        res = x @ params["w_down"].T + params["b_down"]
    else:
        res = x
    return out + res


if __name__ == "__main__":
    key = jax.random.PRNGKey(0)
    kx, kp, kx2 = jax.random.split(key, 3)

    # --- downsample path (n_inputs != n_outputs), fused resident-x path ---
    batch, n_inputs, n_outputs = 8, 32, 64
    x = jax.random.normal(kx, (batch, n_inputs), jnp.float32)
    params = init_dense_block_res_params(kp, n_inputs, n_outputs)
    prep = prepare_params(params)
    out = jax.block_until_ready(dense_block_res(x, prep))
    ref = _reference(x, params)
    assert out.shape == (batch, n_outputs)
    assert jnp.allclose(out, ref, atol=1e-3, rtol=1e-3), "downsample f32 mismatch"

    # --- identity-residual path (n_inputs == n_outputs), fused path ---
    params_eq = init_dense_block_res_params(kp, n_inputs, n_inputs)
    prep_eq = prepare_params(params_eq)
    out_eq = jax.block_until_ready(dense_block_res(x, prep_eq))
    ref_eq = _reference(x, params_eq)
    assert jnp.allclose(out_eq, ref_eq, atol=1e-3, rtol=1e-3), "identity mismatch"

    # --- larger batch: fused AND forced streaming two-pass (exercises grid
    #     tiling, partial tail blocks, in-kernel tail masking) ---
    x_big = jax.random.normal(kx2, (300, n_inputs), jnp.float32)
    ref_big = _reference(x_big, params)
    out_big_fused = jax.block_until_ready(dense_block_res(x_big, prep))
    assert jnp.allclose(out_big_fused, ref_big, atol=1e-3, rtol=1e-3), \
        "fused big-batch mismatch"
    out_big_stream = jax.block_until_ready(
        dense_block_res(x_big, prep, force_two_pass=True))
    assert out_big_stream.shape == (300, n_outputs)
    assert jnp.allclose(out_big_stream, ref_big, atol=1e-3, rtol=1e-3), \
        "streaming big-batch mismatch"

    # --- identity residual through the streaming path ---
    ref_eq_big = _reference(x_big, params_eq)
    out_eq_big = jax.block_until_ready(
        dense_block_res(x_big, prep_eq, force_two_pass=True))
    assert jnp.allclose(out_eq_big, ref_eq_big, atol=1e-3, rtol=1e-3), \
        "streaming identity mismatch"

    # --- bf16 MXU weights (v6e/v7x fast path), f32 accumulation, both paths ---
    prep_bf16 = prepare_params(params, use_bf16_matmul=True)
    out_bf16 = jax.block_until_ready(dense_block_res(x, prep_bf16))
    assert jnp.allclose(out_bf16, ref, atol=5e-2, rtol=5e-2), "bf16 fused mismatch"
    out_bf16_big = jax.block_until_ready(
        dense_block_res(x_big, prep_bf16, force_two_pass=True))
    assert jnp.allclose(out_bf16_big, ref_big, atol=5e-2, rtol=5e-2), \
        "bf16 streaming mismatch"

    print("KERNEL_OK")
</pallas_src>

<mosaic_0001>
module attributes {stable_mosaic.version = 11 : i64} {
  func.func @_fused_kernel(%arg0: i32, %arg1: memref<8x32xf32, #tpu.memory_space<vmem>>, %arg2: memref<1x32xf32, #tpu.memory_space<vmem>>, %arg3: memref<1x32xf32, #tpu.memory_space<vmem>>, %arg4: memref<32x64xf32, #tpu.memory_space<vmem>>, %arg5: memref<32x64xf32, #tpu.memory_space<vmem>>, %arg6: memref<1x64xf32, #tpu.memory_space<vmem>>, %arg7: memref<8x64xf32, #tpu.memory_space<vmem>>) attributes {dimension_semantics = [#tpu.dimension_semantics<arbitrary>], iteration_bounds = array<i64: 1>, scalar_prefetch = 0 : i64, scratch_operands = 0 : i64, tpu.core_type = #tpu.core_type<tc>, window_params = [{pipeline_mode = #tpu.pipeline_mode<synchronous>, transform_indices = @transform_0, window_bounds = array<i64: 8, 32>}, {pipeline_mode = #tpu.pipeline_mode<synchronous>, transform_indices = @transform_1, window_bounds = array<i64: 1, 32>}, {pipeline_mode = #tpu.pipeline_mode<synchronous>, transform_indices = @transform_2, window_bounds = array<i64: 1, 32>}, {pipeline_mode = #tpu.pipeline_mode<synchronous>, transform_indices = @transform_3, window_bounds = array<i64: 32, 64>}, {pipeline_mode = #tpu.pipeline_mode<synchronous>, transform_indices = @transform_4, window_bounds = array<i64: 32, 64>}, {pipeline_mode = #tpu.pipeline_mode<synchronous>, transform_indices = @transform_5, window_bounds = array<i64: 1, 64>}, {pipeline_mode = #tpu.pipeline_mode<synchronous>, transform_indices = @transform_6, window_bounds = array<i64: 8, 64>}]} {
    %c0 = arith.constant 0 : index
    %c0_0 = arith.constant 0 : index
    %0 = vector.load %arg1[%c0, %c0_0] : memref<8x32xf32, #tpu.memory_space<vmem>>, vector<8x32xf32>
    %cst = arith.constant dense<0.000000e+00> : vector<32xf32>
    %1 = vector.multi_reduction <add>, %0, %cst [0] : vector<8x32xf32> to vector<32xf32>
    %2 = vector.shape_cast %1 : vector<32xf32> to vector<1x32xf32>
    %cst_1 = arith.constant 1.250000e-01 : f32
    %3 = vector.broadcast %cst_1 : f32 to vector<1x32xf32>
    %4 = arith.mulf %2, %3 : vector<1x32xf32>
    %5 = vector.broadcast %4 : vector<1x32xf32> to vector<8x32xf32>
    %6 = arith.subf %0, %5 : vector<8x32xf32>
    %7 = arith.mulf %6, %6 : vector<8x32xf32>
    %cst_2 = arith.constant dense<0.000000e+00> : vector<32xf32>
    %8 = vector.multi_reduction <add>, %7, %cst_2 [0] : vector<8x32xf32> to vector<32xf32>
    %9 = vector.shape_cast %8 : vector<32xf32> to vector<1x32xf32>
    %cst_3 = arith.constant 1.250000e-01 : f32
    %10 = vector.broadcast %cst_3 : f32 to vector<1x32xf32>
    %11 = arith.mulf %9, %10 : vector<1x32xf32>
    %c0_4 = arith.constant 0 : index
    %c0_5 = arith.constant 0 : index
    %12 = vector.load %arg2[%c0_4, %c0_5] : memref<1x32xf32, #tpu.memory_space<vmem>>, vector<1x32xf32>
    %cst_6 = arith.constant 9.99999974E-6 : f32
    %13 = vector.broadcast %cst_6 : f32 to vector<1x32xf32>
    %14 = arith.addf %11, %13 : vector<1x32xf32>
    %15 = math.rsqrt %14 : vector<1x32xf32>
    %16 = arith.mulf %12, %15 : vector<1x32xf32>
    %c0_7 = arith.constant 0 : index
    %c0_8 = arith.constant 0 : index
    %17 = vector.load %arg3[%c0_7, %c0_8] : memref<1x32xf32, #tpu.memory_space<vmem>>, vector<1x32xf32>
    %18 = arith.mulf %4, %16 : vector<1x32xf32>
    %19 = arith.subf %17, %18 : vector<1x32xf32>
    %20 = vector.broadcast %16 : vector<1x32xf32> to vector<8x32xf32>
    %21 = arith.mulf %0, %20 : vector<8x32xf32>
    %22 = vector.broadcast %19 : vector<1x32xf32> to vector<8x32xf32>
    %23 = arith.addf %21, %22 : vector<8x32xf32>
    %cst_9 = arith.constant 0.000000e+00 : f32
    %24 = vector.broadcast %cst_9 : f32 to vector<8x32xf32>
    %25 = arith.cmpf oge, %23, %24 : vector<8x32xf32>
    %cst_10 = arith.constant 0.00999999977 : f32
    %26 = vector.broadcast %cst_10 : f32 to vector<8x32xf32>
    %27 = arith.mulf %26, %23 : vector<8x32xf32>
    %28 = arith.select %25, %23, %27 : vector<8x32xi1>, vector<8x32xf32>
    %c0_11 = arith.constant 0 : index
    %c0_12 = arith.constant 0 : index
    %29 = vector.load %arg4[%c0_11, %c0_12] : memref<32x64xf32, #tpu.memory_space<vmem>>, vector<32x64xf32>
    %cst_13 = arith.constant dense<0.000000e+00> : vector<8x64xf32>
    %30 = tpu.matmul %28, %29, %cst_13 {dimension_numbers = #tpu.dot_dimension_numbers<[1], [0], [0], [1], [0, 0, 1, 1], [], []>} : vector<8x32xf32>, vector<32x64xf32>, vector<8x64xf32> -> vector<8x64xf32>
    %c0_14 = arith.constant 0 : index
    %c0_15 = arith.constant 0 : index
    %31 = vector.load %arg5[%c0_14, %c0_15] : memref<32x64xf32, #tpu.memory_space<vmem>>, vector<32x64xf32>
    %cst_16 = arith.constant dense<0.000000e+00> : vector<8x64xf32>
    %32 = tpu.matmul %0, %31, %cst_16 {dimension_numbers = #tpu.dot_dimension_numbers<[1], [0], [0], [1], [0, 0, 1, 1], [], []>} : vector<8x32xf32>, vector<32x64xf32>, vector<8x64xf32> -> vector<8x64xf32>
    %33 = arith.addf %30, %32 : vector<8x64xf32>
    %c0_17 = arith.constant 0 : index
    %c0_18 = arith.constant 0 : index
    %34 = vector.load %arg6[%c0_17, %c0_18] : memref<1x64xf32, #tpu.memory_space<vmem>>, vector<1x64xf32>
    %35 = vector.broadcast %34 : vector<1x64xf32> to vector<8x64xf32>
    %36 = arith.addf %33, %35 : vector<8x64xf32>
    %c0_19 = arith.constant 0 : index
    %c0_20 = arith.constant 0 : index
    %37 = vector.load %arg7[%c0_19, %c0_20] : memref<8x64xf32, #tpu.memory_space<vmem>>, vector<8x64xf32>
    tpu.vector_store %arg7[%c0_19, %c0_20], %36 {strides = array<i32>} : memref<8x64xf32, #tpu.memory_space<vmem>>, vector<8x64xf32>,
    return
  }
  func.func @transform_0(%arg0: i32) -> (i32, i32) {
    %c0_i32 = arith.constant 0 : i32
    %c0_i32_0 = arith.constant 0 : i32
    %c0_i32_1 = arith.constant 0 : i32
    return %c0_i32, %c0_i32_0 : i32, i32
  }
  func.func @transform_1(%arg0: i32) -> (i32, i32) {
    %c0_i32 = arith.constant 0 : i32
    %c0_i32_0 = arith.constant 0 : i32
    %c0_i32_1 = arith.constant 0 : i32
    return %c0_i32, %c0_i32_0 : i32, i32
  }
  func.func @transform_2(%arg0: i32) -> (i32, i32) {
    %c0_i32 = arith.constant 0 : i32
    %c0_i32_0 = arith.constant 0 : i32
    %c0_i32_1 = arith.constant 0 : i32
    return %c0_i32, %c0_i32_0 : i32, i32
  }
  func.func @transform_3(%arg0: i32) -> (i32, i32) {
    %c0_i32 = arith.constant 0 : i32
    %c0_i32_0 = arith.constant 0 : i32
    %c0_i32_1 = arith.constant 0 : i32
    return %c0_i32, %c0_i32_0 : i32, i32
  }
  func.func @transform_4(%arg0: i32) -> (i32, i32) {
    %c0_i32 = arith.constant 0 : i32
    %c0_i32_0 = arith.constant 0 : i32
    %c0_i32_1 = arith.constant 0 : i32
    return %c0_i32, %c0_i32_0 : i32, i32
  }
  func.func @transform_5(%arg0: i32) -> (i32, i32) {
    %c0_i32 = arith.constant 0 : i32
    %c0_i32_0 = arith.constant 0 : i32
    %c0_i32_1 = arith.constant 0 : i32
    return %c0_i32, %c0_i32_0 : i32, i32
  }
  func.func @transform_6(%arg0: i32) -> (i32, i32) {
    %c0_i32 = arith.constant 0 : i32
    %c0_i32_0 = arith.constant 0 : i32
    %c0_i32_1 = arith.constant 0 : i32
    return %c0_i32, %c0_i32_0 : i32, i32
  }
}

</mosaic_0001>

<bundles_post_ra>
// kernel: tpu_custom_call.1
= control target key start
LH: loop header
LB: loop body
LE: loop exit
PB: predicated region body
PF: predicated region fallthrough
CT: control target
= control target key end

     0   :  { %11 = vsyncpa [#allocation3], 0  ;;  %s550_s0 = inlined_call_operand.hbm [shape: f32[8,32], index: 0, kind: input, shape index: {}]   ;;  %s551_s1 = inlined_call_operand.vmem [shape: f32[1,32], index: 1, kind: input, shape index: {}]   ;;  %s552_s2 = inlined_call_operand.vmem [shape: f32[1,32], index: 2, kind: input, shape index: {}]   ;;  %s553_s3 = inlined_call_operand.hbm [shape: f32[32,64], index: 3, kind: input, shape index: {}]   ;;  %s554_s4 = inlined_call_operand.hbm [shape: f32[32,64], index: 4, kind: input, shape index: {}]   ;;  %s555_s5 = inlined_call_operand.vmem [shape: f32[1,64], index: 5, kind: input, shape index: {}]   ;;  %s556_s6 = inlined_call_operand.hbm [shape: f32[8,64], index: 6, kind: output, shape index: {}]  }
   0x1   :  { %12 = vsyncpa [#allocation6], 0 }
   0x2   :  { %13 = vsyncpa [#allocation4], 0  ;;  %s439_s21 = smov [#allocation5]   ;;  %s345_s25 = scalar_lea.hbm %s553_s3, 512 }
   0x3   :  { %s33_s22 = sshll.u32 %s439_s21, 4  ;;  %p346_p0 = scmp.ne.s32.totalorder %s553_s3, %s345_s25  ;;  %s34_s22 = int_to_ptr.vmem [resolvable:$true] %s33_s22 }
   0x4   :  { %p349_p1 = scmp.lt.u32.totalorder %s345_s25, %s553_s3 }
   0x6   :  { %p351_p2 = pnand %p349_p1, %p346_p0 }
   0x8   :  { %354 = shalt.err (!%p351_p2)
}
   0x9   :  { %s355_s30 = scalar_lea.vmem %s34_s22, 512  ;;  %p360_p4 = scmp.lt.s32.totalorder %s34_s22, %s34_s22 }
   0xa   :  { %p356_p3 = scmp.ne.s32.totalorder %s34_s22, %s355_s30  ;;  %p361_p5 = scmp.lt.s32.totalorder %s355_s30, %s355_s30 }
   0xc   :  { %p362_p6 = por %p361_p5, %p360_p4 }
   0xe   :  { %p363_p7 = pnand %p362_p6, %p356_p3 }
  0x10   :  { %366 = shalt.err (!%p363_p7)
}
  0x11   :  { %s440_s7 = smov 128   ;;  %s441_s8 = smov 8  }
  0x12   :  { %39 = dma.hbm_to_vmem [thread:$0]  %s553_s3, 512, %s34_s22, [#allocation6], %s440_s7, %s440_s7, %s441_s8  }
  0x13   :  { %s442_s11 = smov [#allocation2]   ;;  %s443_s13 = smov [#allocation7]  }
  0x14   :  { %s20_s12 = sshll.u32 %s442_s11, 4  ;;  %s45_s14 = sshll.u32 %s443_s13, 4  ;;  %s21_s12 = int_to_ptr.vmem [resolvable:$true] %s20_s12  ;;  %s46_s14 = int_to_ptr.vmem [resolvable:$true] %s45_s14 }
  0x15   :  { %s367_s17 = scalar_lea.hbm %s550_s0, 128 }
  0x16   :  { %p368_p8 = scmp.ne.s32.totalorder %s550_s0, %s367_s17  ;;  %p371_p9 = scmp.lt.u32.totalorder %s367_s17, %s550_s0 }
  0x18   :  { %p373_p10 = pnand %p371_p9, %p368_p8 }
  0x1a   :  { %376 = shalt.err (!%p373_p10)
}
  0x1b   :  { %s377_s3 = scalar_lea.vmem %s21_s12, 128  ;;  %p382_p12 = scmp.lt.s32.totalorder %s21_s12, %s21_s12 }
  0x1c   :  { %p378_p11 = scmp.ne.s32.totalorder %s21_s12, %s377_s3  ;;  %p383_p13 = scmp.lt.s32.totalorder %s377_s3, %s377_s3 }
  0x1e   :  { %p384_p0 = por %p383_p13, %p382_p12 }
  0x20   :  { %p385_p1 = pnand %p384_p0, %p378_p11 }
  0x22   :  { %388 = shalt.err (!%p385_p1)
}
  0x23   :  { %23 = dma.hbm_to_vmem [thread:$0]  %s550_s0, 128, %s21_s12, [#allocation3]  }
  0x24   :  { %s389_s26 = scalar_lea.hbm %s554_s4, 512 }
  0x25   :  { %p390_p2 = scmp.ne.s32.totalorder %s554_s4, %s389_s26  ;;  %p393_p3 = scmp.lt.u32.totalorder %s389_s26, %s554_s4 }
  0x27   :  { %p395_p4 = pnand %p393_p3, %p390_p2 }
  0x29   :  { %398 = shalt.err (!%p395_p4)
}
  0x2a   :  { %s399_s9 = scalar_lea.vmem %s46_s14, 512  ;;  %p404_p6 = scmp.lt.s32.totalorder %s46_s14, %s46_s14 }
  0x2b   :  { %p400_p5 = scmp.ne.s32.totalorder %s46_s14, %s399_s9  ;;  %p405_p7 = scmp.lt.s32.totalorder %s399_s9, %s399_s9 }
  0x2d   :  { %p406_p8 = por %p405_p7, %p404_p6 }
  0x2f   :  { %p407_p9 = pnand %p406_p8, %p400_p5 }
  0x31   :  { %410 = shalt.err (!%p407_p9)
}
  0x32   :  { %51 = dma.hbm_to_vmem [thread:$0]  %s554_s4, 512, %s46_s14, [#allocation6], %s440_s7, %s440_s7, %s441_s8  }
  0x33   :  { %433 = dma.done.wait [#allocation3], 128  }
  0x34   :  { %434 = vsyncadd [#allocation3], 4294967168 }
  0x35   :  { %435 = dma.done.wait [#allocation6], 1024  }
  0x36   :  { %436 = vsyncadd [#allocation6], 4294966272  ;;  %v444_v0 = vmov 0.0|0.0   ;;  %vm445_vm0 = vmmov 0   ;;  %v446_v1 = vmov 0.0   ;;  %v111_v2 = vld [vmem:[#allocation7] sm:$0xff]  ;;  %v91_v34 = vlaneseq }
  0x37   :  { %322 = vmatprep.subr.bf16.mxu0 %v444_v0  ;;  %328 = vmatprep.subr.bf16.mxu1 %v444_v0  ;;  %v112_v3 = vld [vmem:[#allocation7 + $0x8] sm:$0xff]  ;;  %v107_v4 = vld [vmem:[#allocation5] sm:$0xff]  ;;  %vm64_vm1 = vcmask 261120   ;;  %v113_v7 = vld [vmem:[#allocation7 + $0x10] sm:$0xff]  ;;  %s447_s13 = smov [#allocation8]   ;;  %vm269_vm3 = vcmask 523264  }
  0x38   :  { %308 = vmatprep.mubr.msk.f32.mxu0 %vm445_vm0, %v446_v1  ;;  %319 = vmatprep.mubr.msk.f32.mxu1 %vm445_vm0, %v446_v1  ;;  %v323_v5 = vpack.c.bf16 %v112_v3, %v111_v2  ;;  %v108_v6 = vld [vmem:[#allocation5 + $0x8] sm:$0xff]  ;;  %v114_v8 = vld [vmem:[#allocation7 + $0x18] sm:$0xff]  ;;  %v109_v10 = vld [vmem:[#allocation5 + $0x10] sm:$0xff]  ;;  %v92_v35 = vshrl.u32 %v91_v34, 7 }
  0x39   :  { %v329_v9 = vpack.c.bf16 %v108_v6, %v107_v4  ;;  %v110_v11 = vld [vmem:[#allocation5 + $0x18] sm:$0xff]  ;;  %v326_v13 = vpack.c.bf16 %v114_v8, %v113_v7 }
  0x3a   :  { %v63_v12 = vld [vmem:[#allocation2] sm:$0xff]  ;;  %324 = vmatpush3.bf16.msra.mxu0 %v323_v5  ;;  %v332_v15 = vpack.c.bf16 %v110_v11, %v109_v10  ;;  %v93_v37 = vsub.s32 0, %v92_v35 }
  0x3b   :  { %v65_v14 = vsel %vm64_vm1, %v63_v12, 0.0  ;;  %330 = vmatpush3.bf16.msra.mxu1 %v329_v9  ;;  %325 = vmatprep.subr.bf16.mxu0 %v444_v0  ;;  %v83_v36 = vld [vmem:[%s551_s1] sm:$0x1] }
  0x3c   :  { %v66_v16 = vrot.slane %v65_v14, 4  ;;  %331 = vmatprep.subr.bf16.mxu1 %v444_v0  ;;  %v87_v40 = vld [vmem:[%s552_s2] sm:$0x1]  ;;  %s277_s2 = sshll.u32 %s447_s13, 4  ;;  %s278_s2 = int_to_ptr.vmem [resolvable:$true] %s277_s2 }
  0x3d   :  { %v289_v52 = vld [vmem:[%s555_s5] ss:$0 sm:$0xff]  ;;  %s411_s14 = scalar_lea.vmem %s278_s2, 128  ;;  %p416_p11 = scmp.lt.s32.totalorder %s278_s2, %s278_s2 }
  0x3e   :  { %v67_v17 = vadd.f32 %v66_v16, %v65_v14  ;;  %327 = vmatpush3.bf16.msra.mxu0 %v326_v13  ;;  %p412_p10 = scmp.ne.s32.totalorder %s278_s2, %s411_s14  ;;  %p417_p12 = scmp.lt.s32.totalorder %s411_s14, %s411_s14 }
  0x3f   :  { %333 = vmatpush3.bf16.msra.mxu1 %v332_v15 }
  0x40   :  { %v68_v18 = vrot.slane %v67_v17, 2  ;;  %p418_p13 = por %p417_p12, %p416_p11 }
  0x41   :  { %309 = vmatmul.mubr.msk.f32.vlgmr.msra.gmra.mrb[0].mxu0 %vm64_vm1, %v63_v12 }
  0x42   :  { %v69_v19 = vadd.f32 %v68_v18, %v67_v17  ;;  %p419_p0 = pnand %p418_p13, %p412_p10 }
  0x44   :  { %v70_v20 = vrot.slane %v69_v19, 1 }
  0x46   :  { %v71_v21 = vadd.f32 %v70_v20, %v69_v19 }
  0x48   :  { %v72_v22 = vmul.f32 0.125, %v71_v21 }
  0x4a   :  { %v73_v23 = vsub.f32 %v63_v12, %v72_v22 }
  0x4c   :  { %v74_v24 = vmul.f32 %v73_v23, %v73_v23 }
  0x4e   :  { %v75_v25 = vsel %vm64_vm1, %v74_v24, 0.0 }
  0x4f   :  { %v76_v26 = vrot.slane %v75_v25, 4 }
  0x51   :  { %v77_v27 = vadd.f32 %v76_v26, %v75_v25 }
  0x53   :  { %v78_v28 = vrot.slane %v77_v27, 2 }
  0x55   :  { %v79_v29 = vadd.f32 %v78_v28, %v77_v27 }
  0x57   :  { %v80_v30 = vrot.slane %v79_v29, 1 }
  0x59   :  { %v81_v31 = vadd.f32 %v80_v30, %v79_v29 }
  0x5b   :  { %v82_v32 = vmul.f32 0.125, %v81_v31 }
  0x5d   :  { %v84_v33 = vadd.f32 1e-05, %v82_v32 }
  0x5f   :  { %343 = vrsqrt.f32 %v84_v33 }
  0x69   :  { %v344_v38 = vpop.eup %343 }
  0x6a   :  { %v86_v39 = vmul.f32 %v344_v38, %v83_v36 }
  0x6c   :  { %v88_v41 = vmul.f32 %v86_v39, %v72_v22  ;;  %v94_v42 = vrot.slane %v86_v39, %v93_v37 }
  0x6e   :  { %v96_v43 = vmul.f32 %v94_v42, %v63_v12  ;;  %v89_v44 = vsub.f32 %v87_v40, %v88_v41 }
  0x70   :  { %v101_v45 = vrot.slane %v89_v44, %v93_v37 }
  0x72   :  { %v103_v46 = vadd.f32 %v101_v45, %v96_v43 }
  0x74   :  { %vm104_vm2 = vcmp.ge.f32.partialorder %v103_v46, 0.0  ;;  %v105_v47 = vmul.f32 0.01, %v103_v46 }
  0x76   :  { %v106_v48 = vsel %vm104_vm2, %v103_v46, %v105_v47 }
  0x77   :  { %320 = vmatmul.mubr.msk.f32.vlgmr.msra.gmra.mrb[0].mxu1 %vm64_vm1, %v106_v48 }
 0x114   :  { %v184_v49 = vpop.f32.mrb[0].mxu0 }
 0x115   :  { %v310_v50 = vpop.f32.mrb[1].mxu0 }
 0x14a   :  { %v257_v51 = vpop.f32.mrb[0].mxu1 }
 0x14b   :  { %v258_v53 = vadd.f32 %v257_v51, %v184_v49  ;;  %v321_v54 = vpop.f32.mrb[1].mxu1 }
 0x14d   :  { %v268_v55 = vadd.f32 %v289_v52, %v258_v53 }
 0x14f   :  { %270 = vst.msk [vmem:[#allocation8] sm:$0xff] %vm269_vm3, %v268_v55 }
 0x150   :  { %422 = shalt.err (!%p419_p0)
}
 0x151   :  { %s423_s17 = scalar_lea.hbm %s556_s6, 128 }
 0x152   :  { %p424_p1 = scmp.ne.s32.totalorder %s556_s6, %s423_s17  ;;  %p427_p2 = scmp.lt.u32.totalorder %s423_s17, %s556_s6 }
 0x154   :  { %p429_p3 = pnand %p427_p2, %p424_p1 }
 0x156   :  { %432 = shalt.err (!%p429_p3)
}
 0x157   :  { %280 = dma.vmem_to_hbm [thread:$0]  %s278_s2, 128, %s556_s6, [#allocation4]  }
 0x158   :  { %437 = dma.done.wait [#allocation4], 128  }
 0x159   :  { %438 = vsyncadd [#allocation4], 4294967168 }
 0x15a   :  { %284 = vsyncpa [#allocation3], 1 }
 0x15b   :  { %285 = vsyncpa [#allocation6], 1 }
 0x15c   :  { %286 = vsyncpa [#allocation4], 1 }

</bundles_post_ra>
